<compile_context>
chip_gen: v7x
topology: tpu7x:2x2x1
jax: 0.10.0
libtpu: 0.0.40
codegen_flags: <defaults>
</compile_context>

<pallas_src>
import functools

import jax
import jax.numpy as jnp
from jax.experimental import pallas as pl
from jax.experimental.pallas import tpu as pltpu


# ----------------------------------------------------------------------------
# Fused kernel: variational MLP stack + likelihood-transform stack in one pass
# ----------------------------------------------------------------------------
def _fused_mlp_kernel(n_layers_vm, n_layers_lt, latent_dim, x_ref, *refs):
    """Fused eval-mode MLPs on a transposed activation tile.

    x_ref : (tile_m, in_dim) rows-major batch tile (no host transpose/pad).
    refs  : vm (w0^T, b0, ...), lt (w0^T, b0, ...), vm_out_ref, yp_out_ref.
            wi^T is (out_i, in_i) in the compute/storage dtype; bi is (out_i, 1) f32.
    Outputs (transposed, lane-dense):
      vm_out_ref : (out_dim_vm, tile_m)   -- full variational MLP output
      yp_out_ref : (1, tile_m)            -- likelihood transform output
    """
    vm_out_ref = refs[-2]
    yp_out_ref = refs[-1]
    wb = refs[:-2]

    x = x_ref[...]                                   # (tile_m, in_dim), compute dtype
    idx = 0

    # ---- stack 1: variational_model.mlp ----
    # First layer contracts the feature axis of the rows-major tile directly
    # (lhs (out0,in) x rhs (tile_m,in), contracting dim 1 of both -> (out0,tile_m)),
    # so no explicit transpose of x is ever materialized.
    w_t = wb[idx][...]
    b = wb[idx + 1][...]
    idx += 2
    h = jax.lax.dot_general(w_t, x, (((1,), (1,)), ((), ())),
                            preferred_element_type=jnp.float32) + b
    if n_layers_vm > 1:
        h = jnp.maximum(h, 0.0).astype(w_t.dtype)    # ReLU (f32) then storage dtype
    for i in range(1, n_layers_vm):
        w_t = wb[idx][...]
        b = wb[idx + 1][...]
        idx += 2
        h = jnp.dot(w_t, h, preferred_element_type=jnp.float32) + b
        if i < n_layers_vm - 1:
            h = jnp.maximum(h, 0.0).astype(w_t.dtype)
    vm_out_ref[...] = h.astype(vm_out_ref.dtype)     # f32 accumulation result

    # ---- static sublane slice of the latent rows (== outputs[..., :latent_dim]) ----
    z = h[:latent_dim, :]

    # ---- stack 2: likelihood_transform ----
    g = z.astype(wb[idx][...].dtype)
    for i in range(n_layers_lt):
        w_t = wb[idx][...]
        b = wb[idx + 1][...]
        idx += 2
        g = jnp.dot(w_t, g, preferred_element_type=jnp.float32) + b
        if i < n_layers_lt - 1:
            g = jnp.maximum(g, 0.0).astype(w_t.dtype)
    yp_out_ref[...] = g.astype(yp_out_ref.dtype)


# ----------------------------------------------------------------------------
# One-time parameter preparation (hoisted out of the per-call path)
# ----------------------------------------------------------------------------
def prepare_mlp_params(weights, biases, compute_dtype=jnp.float32):
    """Transpose weights to the lane-dense (out, in) layout, cast to the
    compute/storage dtype, reshape biases to (out, 1) float32 columns."""
    cdt = jnp.dtype(compute_dtype)
    prepped = []
    for w, b in zip(weights, biases):
        prepped.append((jnp.asarray(w).T.astype(cdt),
                        jnp.asarray(b).astype(jnp.float32).reshape(-1, 1)))
    return prepped


def _pick_tile_m(m, requested):
    """Lane-aligned row tile.  Full-array tile for tiny m; otherwise capped so
    the 1-D 'parallel' grid has >= 2 steps (lets megacore engage on v7x)."""
    if m <= 128:
        return m
    requested = max(128, (requested // 128) * 128)
    cap = max(128, ((m // 2) // 128) * 128)
    return min(requested, cap)


# ----------------------------------------------------------------------------
# Fused forward wrapper
# ----------------------------------------------------------------------------
def variational_meta_gp_mlps(x, vm_params, lt_params, latent_dim,
                             *, tile_m=2048, out_dtype=jnp.float32):
    """Fused eval-mode forward of variational_model.mlp + likelihood_transform.

    x : (*batch, in_dim) with in_dim = input_dim + 1 (i.e. cat([X, Y[..., None]])).
    Returns (vm_out, y_pred):
      vm_out : (*batch, input_dim + latent_dim)   (mean | embedding)
      y_pred : (*batch,)                          likelihood_transform(mean)[..., 0]
    """
    batch_shape = x.shape[:-1]
    in_dim = x.shape[-1]
    out_dim_vm = vm_params[-1][0].shape[0]
    cdt = vm_params[0][0].dtype

    xr = x.reshape(-1, in_dim)
    if xr.dtype != cdt:
        xr = xr.astype(cdt)
    m = xr.shape[0]

    tm = _pick_tile_m(m, tile_m)
    grid = (pl.cdiv(m, tm),)          # boundary block is masked by Pallas; no host pad

    in_specs = [pl.BlockSpec((tm, in_dim), lambda i: (i, 0))]
    args = [xr]
    for w_t, b_c in list(vm_params) + list(lt_params):
        in_specs.append(pl.BlockSpec(w_t.shape, lambda i: (0, 0)))   # grid-invariant
        in_specs.append(pl.BlockSpec(b_c.shape, lambda i: (0, 0)))   # grid-invariant
        args.append(w_t)
        args.append(b_c)

    out_specs = [
        pl.BlockSpec((out_dim_vm, tm), lambda i: (0, i)),   # lane-dense stores
        pl.BlockSpec((1, tm), lambda i: (0, i)),
    ]
    out_shape = (
        jax.ShapeDtypeStruct((out_dim_vm, m), out_dtype),
        jax.ShapeDtypeStruct((1, m), out_dtype),
    )

    kernel = functools.partial(_fused_mlp_kernel,
                               len(vm_params), len(lt_params), latent_dim)

    vm_t, yp_t = pl.pallas_call(
        kernel,
        out_shape=out_shape,
        grid_spec=pltpu.PrefetchScalarGridSpec(
            num_scalar_prefetch=0,
            grid=grid,
            in_specs=in_specs,
            out_specs=out_specs,
        ),
        compiler_params=pltpu.CompilerParams(
            dimension_semantics=("parallel",)),             # megacore-shardable
    )(*args)

    vm_out = vm_t.T.reshape(*batch_shape, out_dim_vm)
    y_pred = yp_t[0].reshape(batch_shape)
    return vm_out, y_pred


# ----------------------------------------------------------------------------
# Host-side parameter construction (Linear + eval-mode BatchNorm1d folding)
# ----------------------------------------------------------------------------
def fold_batchnorm(w, b, gamma, beta, running_mean, running_var, eps=1e-5):
    """Fold eval-mode BatchNorm1d into the preceding Linear layer."""
    scale = gamma / jnp.sqrt(running_var + eps)
    return w * scale[None, :], (b - running_mean) * scale + beta


def init_mlp_params(key, input_units, hidden_units, output_units, hidden_layers):
    """Xavier-uniform Linear weights, zero biases, fresh BatchNorm stats,
    with BN folded into the Linears (eval-mode semantics of the MLP module)."""
    dims = [input_units] + [hidden_units] * hidden_layers + [output_units]
    weights, biases = [], []
    for i in range(len(dims) - 1):
        fan_in, fan_out = dims[i], dims[i + 1]
        key, sub = jax.random.split(key)
        bound = (6.0 / (fan_in + fan_out)) ** 0.5
        w = jax.random.uniform(sub, (fan_in, fan_out), jnp.float32, -bound, bound)
        b = jnp.zeros((fan_out,), jnp.float32)
        w, b = fold_batchnorm(w, b,
                              jnp.ones((fan_out,), jnp.float32),
                              jnp.zeros((fan_out,), jnp.float32),
                              jnp.zeros((fan_out,), jnp.float32),
                              jnp.ones((fan_out,), jnp.float32))
        weights.append(w)
        biases.append(b)
    return weights, biases


def _reference_forward(x, weights, biases):
    """Plain-JAX reference of the same folded-BN MLP stack."""
    batch_shape = x.shape[:-1]
    h = x.reshape(-1, x.shape[-1]).astype(jnp.float32)
    for i, (w, b) in enumerate(zip(weights, biases)):
        h = h @ w + b
        if i < len(weights) - 1:
            h = jnp.maximum(h, 0.0)
    return h.reshape(*batch_shape, -1)


# ----------------------------------------------------------------------------
# Demo: VariationalMetaGP forward data path (fused MLPs on TPU via Pallas)
# ----------------------------------------------------------------------------
if __name__ == "__main__":
    input_dim, hidden_units, latent_dim, hidden_layers = 15, 32, 16, 2
    tasks, n_points = 2, 8

    key = jax.random.PRNGKey(0)
    key, kx, ky, k1, k2 = jax.random.split(key, 5)

    X = jax.random.normal(kx, (tasks, n_points, input_dim), jnp.float32)
    Y = jax.random.normal(ky, (tasks, n_points), jnp.float32)

    # variational_model.mlp : (input_dim+1) -> hidden -> ... -> (input_dim+latent_dim)
    vm_w, vm_b = init_mlp_params(k1, input_dim + 1, hidden_units,
                                 input_dim + latent_dim, hidden_layers)
    # likelihood_transform : latent_dim -> hidden -> ... -> 1
    lt_w, lt_b = init_mlp_params(k2, latent_dim, hidden_units, 1, hidden_layers)

    # One-time parameter prep (transpose / cast / bias reshape) -- out of the
    # forward path.  Use jnp.bfloat16 here on v6e/v7x for the HBM-bound case.
    vm_p32 = prepare_mlp_params(vm_w, vm_b, jnp.float32)
    lt_p32 = prepare_mlp_params(lt_w, lt_b, jnp.float32)

    fwd = jax.jit(functools.partial(variational_meta_gp_mlps, latent_dim=latent_dim))

    # --- VariationalModel.forward (MLP part) + likelihood_transform, fused ---
    inputs = jnp.concatenate([X, Y[..., None]], axis=-1)      # (tasks, n, input_dim+1)
    vm_out, Y_pred = fwd(inputs, vm_p32, lt_p32)
    vm_out, Y_pred = jax.block_until_ready((vm_out, Y_pred))

    mean = vm_out[..., :latent_dim]                           # variational mean
    embedding = vm_out[..., latent_dim:]                      # deep-kernel embedding
    assert embedding.shape[-1] == input_dim

    # likelihood_transform is applied to the latent (mean used as the Z "sample").
    # TODO(synk): gpytorch GP machinery (RBF MultitaskKernel covariance, GP
    # posterior conditioning / MultitaskMultivariateNormal sampling, KL term)
    # has no clean Pallas equivalent and is not reproduced here.

    # --- correctness vs plain-JAX reference of the same folded-BN MLPs ---
    ref_vm = _reference_forward(inputs, vm_w, vm_b)
    ref_yp = _reference_forward(ref_vm[..., :latent_dim], lt_w, lt_b)[..., 0]
    assert vm_out.shape == (tasks, n_points, input_dim + latent_dim), vm_out.shape
    assert Y_pred.shape == (tasks, n_points), Y_pred.shape
    assert jnp.allclose(vm_out, ref_vm, atol=1e-5, rtol=1e-5), "vm mismatch"
    assert jnp.allclose(Y_pred, ref_yp, atol=1e-5, rtol=1e-5), "y_pred mismatch"

    # --- larger batch: exercises the multi-step grid (megacore-shardable) and
    #     the masked boundary block (m = 400 not a multiple of the 128 tile) ---
    kx2, ky2 = jax.random.split(key, 2)
    X2 = jax.random.normal(kx2, (4, 100, input_dim), jnp.float32)
    Y2 = jax.random.normal(ky2, (4, 100), jnp.float32)
    inputs2 = jnp.concatenate([X2, Y2[..., None]], axis=-1)
    vm_out2, Y_pred2 = fwd(inputs2, vm_p32, lt_p32)
    vm_out2, Y_pred2 = jax.block_until_ready((vm_out2, Y_pred2))
    ref_vm2 = _reference_forward(inputs2, vm_w, vm_b)
    ref_yp2 = _reference_forward(ref_vm2[..., :latent_dim], lt_w, lt_b)[..., 0]
    assert jnp.allclose(vm_out2, ref_vm2, atol=1e-4, rtol=1e-4), "vm (tiled) mismatch"
    assert jnp.allclose(Y_pred2, ref_yp2, atol=1e-4, rtol=1e-4), "y_pred (tiled) mismatch"

    # --- bf16 storage / f32 accumulation path (v6e / v7x bandwidth lever) ---
    vm_pbf = prepare_mlp_params(vm_w, vm_b, jnp.bfloat16)
    lt_pbf = prepare_mlp_params(lt_w, lt_b, jnp.bfloat16)
    vm_out_bf, Y_pred_bf = fwd(inputs, vm_pbf, lt_pbf)
    vm_out_bf, Y_pred_bf = jax.block_until_ready((vm_out_bf, Y_pred_bf))
    assert jnp.allclose(vm_out_bf, ref_vm, atol=1e-1, rtol=1e-1), "bf16 vm mismatch"
    assert jnp.allclose(Y_pred_bf, ref_yp, atol=1e-1, rtol=1e-1), "bf16 y_pred mismatch"

    print("KERNEL_OK")
</pallas_src>

<mosaic_0001>
module attributes {stable_mosaic.version = 11 : i64} {
  func.func @_fused_mlp_kernel(%arg0: i32, %arg1: memref<16x16xf32, #tpu.memory_space<vmem>>, %arg2: memref<32x16xf32, #tpu.memory_space<vmem>>, %arg3: memref<32x1xf32, #tpu.memory_space<vmem>>, %arg4: memref<32x32xf32, #tpu.memory_space<vmem>>, %arg5: memref<32x1xf32, #tpu.memory_space<vmem>>, %arg6: memref<31x32xf32, #tpu.memory_space<vmem>>, %arg7: memref<31x1xf32, #tpu.memory_space<vmem>>, %arg8: memref<32x16xf32, #tpu.memory_space<vmem>>, %arg9: memref<32x1xf32, #tpu.memory_space<vmem>>, %arg10: memref<32x32xf32, #tpu.memory_space<vmem>>, %arg11: memref<32x1xf32, #tpu.memory_space<vmem>>, %arg12: memref<1x32xf32, #tpu.memory_space<vmem>>, %arg13: memref<1x1xf32, #tpu.memory_space<vmem>>, %arg14: memref<31x16xf32, #tpu.memory_space<vmem>>, %arg15: memref<1x16xf32, #tpu.memory_space<vmem>>) attributes {dimension_semantics = [#tpu.dimension_semantics<parallel>], iteration_bounds = array<i64: 1>, scalar_prefetch = 0 : i64, scratch_operands = 0 : i64, tpu.core_type = #tpu.core_type<tc>, window_params = [{transform_indices = @transform_0, window_bounds = array<i64: 16, 16>}, {pipeline_mode = #tpu.pipeline_mode<synchronous>, transform_indices = @transform_1, window_bounds = array<i64: 32, 16>}, {pipeline_mode = #tpu.pipeline_mode<synchronous>, transform_indices = @transform_2, window_bounds = array<i64: 32, 1>}, {pipeline_mode = #tpu.pipeline_mode<synchronous>, transform_indices = @transform_3, window_bounds = array<i64: 32, 32>}, {pipeline_mode = #tpu.pipeline_mode<synchronous>, transform_indices = @transform_4, window_bounds = array<i64: 32, 1>}, {pipeline_mode = #tpu.pipeline_mode<synchronous>, transform_indices = @transform_5, window_bounds = array<i64: 31, 32>}, {pipeline_mode = #tpu.pipeline_mode<synchronous>, transform_indices = @transform_6, window_bounds = array<i64: 31, 1>}, {pipeline_mode = #tpu.pipeline_mode<synchronous>, transform_indices = @transform_7, window_bounds = array<i64: 32, 16>}, {pipeline_mode = #tpu.pipeline_mode<synchronous>, transform_indices = @transform_8, window_bounds = array<i64: 32, 1>}, {pipeline_mode = #tpu.pipeline_mode<synchronous>, transform_indices = @transform_9, window_bounds = array<i64: 32, 32>}, {pipeline_mode = #tpu.pipeline_mode<synchronous>, transform_indices = @transform_10, window_bounds = array<i64: 32, 1>}, {pipeline_mode = #tpu.pipeline_mode<synchronous>, transform_indices = @transform_11, window_bounds = array<i64: 1, 32>}, {pipeline_mode = #tpu.pipeline_mode<synchronous>, transform_indices = @transform_12, window_bounds = array<i64: 1, 1>}, {transform_indices = @transform_13, window_bounds = array<i64: 31, 16>}, {transform_indices = @transform_14, window_bounds = array<i64: 1, 16>}]} {
    %c0 = arith.constant 0 : index
    %c0_0 = arith.constant 0 : index
    %0 = vector.load %arg1[%c0, %c0_0] : memref<16x16xf32, #tpu.memory_space<vmem>>, vector<16x16xf32>
    %c0_1 = arith.constant 0 : index
    %c0_2 = arith.constant 0 : index
    %1 = vector.load %arg2[%c0_1, %c0_2] : memref<32x16xf32, #tpu.memory_space<vmem>>, vector<32x16xf32>
    %c0_3 = arith.constant 0 : index
    %c0_4 = arith.constant 0 : index
    %2 = vector.load %arg3[%c0_3, %c0_4] : memref<32x1xf32, #tpu.memory_space<vmem>>, vector<32x1xf32>
    %cst = arith.constant dense<0.000000e+00> : vector<32x16xf32>
    %3 = tpu.matmul %1, %0, %cst {dimension_numbers = #tpu.dot_dimension_numbers<[1], [1], [0], [0], [0, 0, 1, 0], [], []>} : vector<32x16xf32>, vector<16x16xf32>, vector<32x16xf32> -> vector<32x16xf32>
    %4 = vector.broadcast %2 : vector<32x1xf32> to vector<32x16xf32>
    %5 = arith.addf %3, %4 : vector<32x16xf32>
    %cst_5 = arith.constant 0.000000e+00 : f32
    %6 = vector.broadcast %cst_5 : f32 to vector<32x16xf32>
    %7 = arith.maximumf %5, %6 : vector<32x16xf32>
    %c0_6 = arith.constant 0 : index
    %c0_7 = arith.constant 0 : index
    %8 = vector.load %arg4[%c0_6, %c0_7] : memref<32x32xf32, #tpu.memory_space<vmem>>, vector<32x32xf32>
    %c0_8 = arith.constant 0 : index
    %c0_9 = arith.constant 0 : index
    %9 = vector.load %arg5[%c0_8, %c0_9] : memref<32x1xf32, #tpu.memory_space<vmem>>, vector<32x1xf32>
    %cst_10 = arith.constant dense<0.000000e+00> : vector<32x16xf32>
    %10 = tpu.matmul %8, %7, %cst_10 {dimension_numbers = #tpu.dot_dimension_numbers<[1], [0], [0], [1], [0, 0, 1, 1], [], []>} : vector<32x32xf32>, vector<32x16xf32>, vector<32x16xf32> -> vector<32x16xf32>
    %11 = vector.broadcast %9 : vector<32x1xf32> to vector<32x16xf32>
    %12 = arith.addf %10, %11 : vector<32x16xf32>
    %cst_11 = arith.constant 0.000000e+00 : f32
    %13 = vector.broadcast %cst_11 : f32 to vector<32x16xf32>
    %14 = arith.maximumf %12, %13 : vector<32x16xf32>
    %c0_12 = arith.constant 0 : index
    %c0_13 = arith.constant 0 : index
    %15 = vector.load %arg6[%c0_12, %c0_13] : memref<31x32xf32, #tpu.memory_space<vmem>>, vector<31x32xf32>
    %c0_14 = arith.constant 0 : index
    %c0_15 = arith.constant 0 : index
    %16 = vector.load %arg7[%c0_14, %c0_15] : memref<31x1xf32, #tpu.memory_space<vmem>>, vector<31x1xf32>
    %cst_16 = arith.constant dense<0.000000e+00> : vector<31x16xf32>
    %17 = tpu.matmul %15, %14, %cst_16 {dimension_numbers = #tpu.dot_dimension_numbers<[1], [0], [0], [1], [0, 0, 1, 1], [], []>} : vector<31x32xf32>, vector<32x16xf32>, vector<31x16xf32> -> vector<31x16xf32>
    %18 = vector.broadcast %16 : vector<31x1xf32> to vector<31x16xf32>
    %19 = arith.addf %17, %18 : vector<31x16xf32>
    %c0_17 = arith.constant 0 : index
    %c0_18 = arith.constant 0 : index
    %20 = vector.load %arg14[%c0_17, %c0_18] : memref<31x16xf32, #tpu.memory_space<vmem>>, vector<31x16xf32>
    tpu.vector_store %arg14[%c0_17, %c0_18], %19 {strides = array<i32>} : memref<31x16xf32, #tpu.memory_space<vmem>>, vector<31x16xf32>,
    %21 = vector.extract_strided_slice %19 {offsets = [0, 0], sizes = [16, 16], strides = [1, 1]} : vector<31x16xf32> to vector<16x16xf32>
    %c0_19 = arith.constant 0 : index
    %c0_20 = arith.constant 0 : index
    %22 = vector.load %arg8[%c0_19, %c0_20] : memref<32x16xf32, #tpu.memory_space<vmem>>, vector<32x16xf32>
    %c0_21 = arith.constant 0 : index
    %c0_22 = arith.constant 0 : index
    %23 = vector.load %arg9[%c0_21, %c0_22] : memref<32x1xf32, #tpu.memory_space<vmem>>, vector<32x1xf32>
    %cst_23 = arith.constant dense<0.000000e+00> : vector<32x16xf32>
    %24 = tpu.matmul %22, %21, %cst_23 {dimension_numbers = #tpu.dot_dimension_numbers<[1], [0], [0], [1], [0, 0, 1, 1], [], []>} : vector<32x16xf32>, vector<16x16xf32>, vector<32x16xf32> -> vector<32x16xf32>
    %25 = vector.broadcast %23 : vector<32x1xf32> to vector<32x16xf32>
    %26 = arith.addf %24, %25 : vector<32x16xf32>
    %cst_24 = arith.constant 0.000000e+00 : f32
    %27 = vector.broadcast %cst_24 : f32 to vector<32x16xf32>
    %28 = arith.maximumf %26, %27 : vector<32x16xf32>
    %c0_25 = arith.constant 0 : index
    %c0_26 = arith.constant 0 : index
    %29 = vector.load %arg10[%c0_25, %c0_26] : memref<32x32xf32, #tpu.memory_space<vmem>>, vector<32x32xf32>
    %c0_27 = arith.constant 0 : index
    %c0_28 = arith.constant 0 : index
    %30 = vector.load %arg11[%c0_27, %c0_28] : memref<32x1xf32, #tpu.memory_space<vmem>>, vector<32x1xf32>
    %cst_29 = arith.constant dense<0.000000e+00> : vector<32x16xf32>
    %31 = tpu.matmul %29, %28, %cst_29 {dimension_numbers = #tpu.dot_dimension_numbers<[1], [0], [0], [1], [0, 0, 1, 1], [], []>} : vector<32x32xf32>, vector<32x16xf32>, vector<32x16xf32> -> vector<32x16xf32>
    %32 = vector.broadcast %30 : vector<32x1xf32> to vector<32x16xf32>
    %33 = arith.addf %31, %32 : vector<32x16xf32>
    %cst_30 = arith.constant 0.000000e+00 : f32
    %34 = vector.broadcast %cst_30 : f32 to vector<32x16xf32>
    %35 = arith.maximumf %33, %34 : vector<32x16xf32>
    %c0_31 = arith.constant 0 : index
    %c0_32 = arith.constant 0 : index
    %36 = vector.load %arg12[%c0_31, %c0_32] : memref<1x32xf32, #tpu.memory_space<vmem>>, vector<1x32xf32>
    %c0_33 = arith.constant 0 : index
    %c0_34 = arith.constant 0 : index
    %37 = vector.load %arg13[%c0_33, %c0_34] : memref<1x1xf32, #tpu.memory_space<vmem>>, vector<1x1xf32>
    %cst_35 = arith.constant dense<0.000000e+00> : vector<1x16xf32>
    %38 = tpu.matmul %36, %35, %cst_35 {dimension_numbers = #tpu.dot_dimension_numbers<[1], [0], [0], [1], [0, 0, 1, 1], [], []>} : vector<1x32xf32>, vector<32x16xf32>, vector<1x16xf32> -> vector<1x16xf32>
    %39 = vector.broadcast %37 : vector<1x1xf32> to vector<1x16xf32>
    %40 = arith.addf %38, %39 : vector<1x16xf32>
    %c0_36 = arith.constant 0 : index
    %c0_37 = arith.constant 0 : index
    %41 = vector.load %arg15[%c0_36, %c0_37] : memref<1x16xf32, #tpu.memory_space<vmem>>, vector<1x16xf32>
    tpu.vector_store %arg15[%c0_36, %c0_37], %40 {strides = array<i32>} : memref<1x16xf32, #tpu.memory_space<vmem>>, vector<1x16xf32>,
    return
  }
  func.func @transform_0(%arg0: i32) -> (i32, i32) {
    %c0_i32 = arith.constant 0 : i32
    %c0_i32_0 = arith.constant 0 : i32
    return %arg0, %c0_i32 : i32, i32
  }
  func.func @transform_1(%arg0: i32) -> (i32, i32) {
    %c0_i32 = arith.constant 0 : i32
    %c0_i32_0 = arith.constant 0 : i32
    %c0_i32_1 = arith.constant 0 : i32
    return %c0_i32, %c0_i32_0 : i32, i32
  }
  func.func @transform_2(%arg0: i32) -> (i32, i32) {
    %c0_i32 = arith.constant 0 : i32
    %c0_i32_0 = arith.constant 0 : i32
    %c0_i32_1 = arith.constant 0 : i32
    return %c0_i32, %c0_i32_0 : i32, i32
  }
  func.func @transform_3(%arg0: i32) -> (i32, i32) {
    %c0_i32 = arith.constant 0 : i32
    %c0_i32_0 = arith.constant 0 : i32
    %c0_i32_1 = arith.constant 0 : i32
    return %c0_i32, %c0_i32_0 : i32, i32
  }
  func.func @transform_4(%arg0: i32) -> (i32, i32) {
    %c0_i32 = arith.constant 0 : i32
    %c0_i32_0 = arith.constant 0 : i32
    %c0_i32_1 = arith.constant 0 : i32
    return %c0_i32, %c0_i32_0 : i32, i32
  }
  func.func @transform_5(%arg0: i32) -> (i32, i32) {
    %c0_i32 = arith.constant 0 : i32
    %c0_i32_0 = arith.constant 0 : i32
    %c0_i32_1 = arith.constant 0 : i32
    return %c0_i32, %c0_i32_0 : i32, i32
  }
  func.func @transform_6(%arg0: i32) -> (i32, i32) {
    %c0_i32 = arith.constant 0 : i32
    %c0_i32_0 = arith.constant 0 : i32
    %c0_i32_1 = arith.constant 0 : i32
    return %c0_i32, %c0_i32_0 : i32, i32
  }
  func.func @transform_7(%arg0: i32) -> (i32, i32) {
    %c0_i32 = arith.constant 0 : i32
    %c0_i32_0 = arith.constant 0 : i32
    %c0_i32_1 = arith.constant 0 : i32
    return %c0_i32, %c0_i32_0 : i32, i32
  }
  func.func @transform_8(%arg0: i32) -> (i32, i32) {
    %c0_i32 = arith.constant 0 : i32
    %c0_i32_0 = arith.constant 0 : i32
    %c0_i32_1 = arith.constant 0 : i32
    return %c0_i32, %c0_i32_0 : i32, i32
  }
  func.func @transform_9(%arg0: i32) -> (i32, i32) {
    %c0_i32 = arith.constant 0 : i32
    %c0_i32_0 = arith.constant 0 : i32
    %c0_i32_1 = arith.constant 0 : i32
    return %c0_i32, %c0_i32_0 : i32, i32
  }
  func.func @transform_10(%arg0: i32) -> (i32, i32) {
    %c0_i32 = arith.constant 0 : i32
    %c0_i32_0 = arith.constant 0 : i32
    %c0_i32_1 = arith.constant 0 : i32
    return %c0_i32, %c0_i32_0 : i32, i32
  }
  func.func @transform_11(%arg0: i32) -> (i32, i32) {
    %c0_i32 = arith.constant 0 : i32
    %c0_i32_0 = arith.constant 0 : i32
    %c0_i32_1 = arith.constant 0 : i32
    return %c0_i32, %c0_i32_0 : i32, i32
  }
  func.func @transform_12(%arg0: i32) -> (i32, i32) {
    %c0_i32 = arith.constant 0 : i32
    %c0_i32_0 = arith.constant 0 : i32
    %c0_i32_1 = arith.constant 0 : i32
    return %c0_i32, %c0_i32_0 : i32, i32
  }
  func.func @transform_13(%arg0: i32) -> (i32, i32) {
    %c0_i32 = arith.constant 0 : i32
    %c0_i32_0 = arith.constant 0 : i32
    return %c0_i32, %arg0 : i32, i32
  }
  func.func @transform_14(%arg0: i32) -> (i32, i32) {
    %c0_i32 = arith.constant 0 : i32
    %c0_i32_0 = arith.constant 0 : i32
    return %c0_i32, %arg0 : i32, i32
  }
}

</mosaic_0001>

<bundles_post_ra>
// kernel: squeeze.1
= control target key start
LH: loop header
LB: loop body
LE: loop exit
PB: predicated region body
PF: predicated region fallthrough
CT: control target
= control target key end

     0   :  { %s85_s0 = inlined_call_operand.vmem [shape: f32[16], index: 0, kind: input, shape index: {}]   ;;  %s86_s1 = inlined_call_operand.hbm [shape: f32[2,8], index: 1, kind: output, shape index: {}]  }
   0x1   :  { %v5_v0 = vld [vmem:[%s85_s0] sm:$0x1] }
   0x2   :  { %2 = vsyncpa [#allocation1], 0  ;;  %6 = vst [vmem:[#allocation3] sm:$0x1] %v5_v0  ;;  %vm8_vm0 = vcmask 64512   ;;  %s58_s0 = smov 120  }
   0x3   :  { %s59_s8 = smov [#allocation0]  }
   0x4   :  { %s26_s9 = sshll.u32 %s59_s8, 4  ;;  %s27_s9 = int_to_ptr.vmem [resolvable:$true] %s26_s9 }
   0x5   :  { %s34_s10 = scalar_lea.vmem %s27_s9, 32  ;;  %p39_p1 = scmp.lt.s32.totalorder %s27_s9, %s27_s9 }
   0x6   :  { %p35_p0 = scmp.ne.s32.totalorder %s27_s9, %s34_s10  ;;  %p40_p2 = scmp.lt.s32.totalorder %s34_s10, %s34_s10 }
   0x8   :  { %p41_p3 = por %p40_p2, %p39_p1 }
   0x9   :  { %v10_v1 = vld [vmem:[#allocation3] sm:$0x1]  }
   0xa   :  { %v7_v2 = vld [vmem:[#allocation3] sm:$0x1]   ;;  %11 = vrot.lane.b32.xlu0 %v10_v1, %s58_s0  ;;  %p42_p4 = pnand %p41_p3, %p35_p0 }
   0xb   :  { %9 = vst.msk [vmem:[#allocation2] sm:$0x1] %vm8_vm0, %v7_v2  }
  0x7c   :  { %v12_v3 = vpop.permute.xlu0 %11  }
  0x7d   :  { %15 = vst.msk [vmem:[#allocation2 + $0x1] sm:$0x1] %vm8_vm0, %v12_v3  }
  0x84   :  { %v19_v4 = vld [vmem:[#allocation2] sm:$0x3] }
  0x85   :  { %21 = vst [vmem:[#allocation0] sm:$0x3] %v19_v4 }
  0x86   :  { %45 = shalt.err (!%p42_p4)
}
  0x87   :  { %s46_s13 = scalar_lea.hbm %s86_s1, 32 }
  0x88   :  { %p47_p5 = scmp.ne.s32.totalorder %s86_s1, %s46_s13  ;;  %p50_p6 = scmp.lt.u32.totalorder %s46_s13, %s86_s1 }
  0x8a   :  { %p52_p7 = pnand %p50_p6, %p47_p5 }
  0x8c   :  { %55 = shalt.err (!%p52_p7)
}
  0x8d   :  { %29 = dma.vmem_to_hbm [thread:$0]  %s27_s9, 32, %s86_s1, [#allocation1]  }
  0x8e   :  { %56 = dma.done.wait [#allocation1], 32  }
  0x8f   :  { %57 = vsyncadd [#allocation1], 4294967264 }
  0x90   :  { %31 = vsyncpa [#allocation1], 1 }

// kernel: variational_meta_gp_mlps.1
= control target key start
LH: loop header
LB: loop body
LE: loop exit
PB: predicated region body
PF: predicated region fallthrough
CT: control target
= control target key end

     0   :  { %vm78_vm0 = vcmask 130048   ;;  %v981_v2 = vmov 0   ;;  %vm214_vm2 = vcmask 261120   ;;  %vm444_vm3 = vcmask 129024   ;;  %s1245_s0 = inlined_call_operand.vmem [shape: f32[16,16], index: 0, kind: input, shape index: {}]   ;;  %s1246_s1 = inlined_call_operand.vmem [shape: f32[32,16], index: 1, kind: input, shape index: {}]   ;;  %s1247_s2 = inlined_call_operand.vmem [shape: f32[32,1], index: 2, kind: input, shape index: {}]   ;;  %s1248_s12 = inlined_call_operand.<no memory space> [shape: f32[1,1], index: 12, kind: input, shape index: {}]   ;;  %s1249_s4 = inlined_call_operand.vmem [shape: f32[32,1], index: 4, kind: input, shape index: {}]   ;;  %s1250_s6 = inlined_call_operand.vmem [shape: f32[31,1], index: 6, kind: input, shape index: {}]   ;;  %s1251_s8 = inlined_call_operand.vmem [shape: f32[32,1], index: 8, kind: input, shape index: {}]   ;;  %s1252_s10 = inlined_call_operand.vmem [shape: f32[32,1], index: 10, kind: input, shape index: {}]   ;;  %s1253_s3 = inlined_call_operand.vmem [shape: f32[32,32], index: 3, kind: input, shape index: {}]   ;;  %s1254_s5 = inlined_call_operand.vmem [shape: f32[31,32], index: 5, kind: input, shape index: {}]   ;;  %s1255_s7 = inlined_call_operand.vmem [shape: f32[32,16], index: 7, kind: input, shape index: {}]   ;;  %s1256_s13 = inlined_call_operand.vmem [shape: f32[31,16], index: 13, kind: output, shape index: {0}]   ;;  %s1257_s9 = inlined_call_operand.vmem [shape: f32[32,32], index: 9, kind: input, shape index: {}]   ;;  %s1258_s11 = inlined_call_operand.vmem [shape: f32[1,32], index: 11, kind: input, shape index: {}]   ;;  %s1259_s14 = inlined_call_operand.vmem [shape: f32[1,16], index: 14, kind: output, shape index: {1}]  }
   0x1   :  { %v48_v0 = vld [vmem:[%s1245_s0] sm:$0xff]  ;;  %v49_v1 = vld [vmem:[%s1245_s0 + $0x8] sm:$0xff]  ;;  %vm936_vm1 = vmpackc.low %vm78_vm0, %vm78_vm0  ;;  %979 = vset.pattern.permute.xlu0 %v981_v2  ;;  %980 = vset.pattern.permute.xlu1 %v981_v2  ;;  %v20_v3 = vstv %s1248_s12  ;;  %vm983_vm4 = vmmov 0   ;;  %vm788_vm5 = vcmask 122880  }
   0x2   :  { %v935_v4 = vpack.c.bf16 %v49_v1, %v48_v0  ;;  %v50_v5 = vld [vmem:[%s1246_s1] sm:$0xff]  ;;  %21 = vst [vmem:[#allocation2] sm:$0x1] %v20_v3  ;;  %v56_v7 = vld [vmem:[%s1247_s2 + $0x10] sm:$0xff]  ;;  %v55_v8 = vld [vmem:[%s1247_s2 + $0x8] sm:$0xff] }
   0x3   :  { %866 = vmatprep.mubr.msk.f32.mxu0 %vm78_vm0, %v50_v5  ;;  %v54_v6 = vld [vmem:[%s1247_s2] sm:$0xff]  ;;  %70 = vperm.xlu1 %980, %v56_v7   ;;  %v57_v9 = vld [vmem:[%s1247_s2 + $0x18] sm:$0xff]  ;;  %v51_v10 = vld [vmem:[%s1246_s1 + $0x8] sm:$0xff] }
   0x4   :  { %937 = vmatprep.subr.msk.bf16.mxu0 %vm936_vm1, %v935_v4  ;;  %60 = vperm.xlu0 %979, %v54_v6   ;;  %v190_v11 = vld [vmem:[%s1249_s4] sm:$0xff]  ;;  %v52_v12 = vld [vmem:[%s1246_s1 + $0x10] sm:$0xff]  ;;  %v191_v13 = vld [vmem:[%s1249_s4 + $0x8] sm:$0xff] }
   0x5   :  { %940 = vmatpush3.bf16.xpose.msk.msra.mxu0 %vm936_vm1, %v935_v4  ;;  %v53_v14 = vld [vmem:[%s1246_s1 + $0x18] sm:$0xff]  ;;  %v192_v15 = vld [vmem:[%s1249_s4 + $0x10] sm:$0xff]  ;;  %v320_v17 = vld [vmem:[%s1250_s6] sm:$0xff] }
   0x6   :  { %v193_v16 = vld [vmem:[%s1249_s4 + $0x18] sm:$0xff]  ;;  %v321_v18 = vld [vmem:[%s1250_s6 + $0x8] sm:$0xff]  ;;  %v450_v19 = vld [vmem:[%s1251_s8] sm:$0xff] }
   0x7   :  { %75 = vperm.xlu1 %980, %v57_v9   ;;  %v451_v20 = vld [vmem:[%s1251_s8 + $0x8] sm:$0xff]  ;;  %v452_v21 = vld [vmem:[%s1251_s8 + $0x10] sm:$0xff]  ;;  %v453_v22 = vld [vmem:[%s1251_s8 + $0x18] sm:$0xff] }
   0x8   :  { %65 = vperm.xlu0 %979, %v55_v8   ;;  %v579_v23 = vld [vmem:[%s1252_s10] sm:$0xff]  ;;  %v580_v24 = vld [vmem:[%s1252_s10 + $0x8] sm:$0xff]  ;;  %v581_v25 = vld [vmem:[%s1252_s10 + $0x10] sm:$0xff] }
   0x9   :  { %v582_v26 = vld [vmem:[%s1252_s10 + $0x18] sm:$0xff]  ;;  %v705_v27 = vld [vmem:[#allocation2] sm:$0x1]  ;;  %v322_v28 = vld [vmem:[%s1250_s6 + $0x10] sm:$0xff] }
   0xa   :  { %v323_v29 = vld [vmem:[%s1250_s6 + $0x18] sm:$0x7f]  ;;  %v186_v30 = vld [vmem:[%s1253_s3] sm:$0xff]  ;;  %v187_v49 = vld [vmem:[%s1253_s3 + $0x8] sm:$0xff] }
   0xb   :  { %201 = vperm.xlu1 %980, %v191_v13   ;;  %880 = vmatprep.mubr.msk.f32.mxu1 %vm214_vm2, %v186_v30  ;;  %v188_v50 = vld [vmem:[%s1253_s3 + $0x10] sm:$0xff]  ;;  %v189_v51 = vld [vmem:[%s1253_s3 + $0x18] sm:$0xff]  ;;  %v316_v52 = vld [vmem:[%s1254_s5] sm:$0xff] }
   0xc   :  { %867 = vmatmul.mubr.msk.f32.vlgmr.msra.gmra.mrb[0].mxu0 %vm78_vm0, %v51_v10  ;;  %196 = vperm.xlu0 %979, %v190_v11   ;;  %v317_v7 = vld [vmem:[%s1254_s5 + $0x8] sm:$0xff]  ;;  %v318_v8 = vld [vmem:[%s1254_s5 + $0x10] sm:$0xff]  ;;  %v319_v9 = vld [vmem:[%s1254_s5 + $0x18] sm:$0x7f] }
   0xd   :  { %869 = vmatprep.mubr.msk.f32.mxu0 %vm78_vm0, %v52_v12  ;;  %v446_v10 = vld [vmem:[%s1255_s7] sm:$0xff] }
   0xf   :  { %211 = vperm.xlu1 %980, %v193_v16  }
  0x10   :  { %870 = vmatmul.mubr.msk.f32.gmra.mrb[2].mxu0 %vm78_vm0, %v53_v14  ;;  %206 = vperm.xlu0 %979, %v192_v15  }
  0x11   :  { %894 = vmatprep.mubr.msk.f32.mxu0 %vm214_vm2, %v316_v52  ;;  %v577_v52 = vld [vmem:[%s1257_s9 + $0x10] sm:$0xff] }
  0x13   :  { %331 = vperm.xlu1 %980, %v321_v18  }
  0x14   :  { %326 = vperm.xlu0 %979, %v320_v17  }
  0x17   :  { %461 = vperm.xlu1 %980, %v451_v20  }
  0x18   :  { %456 = vperm.xlu0 %979, %v450_v19  }
  0x1b   :  { %471 = vperm.xlu1 %980, %v453_v22  }
  0x1c   :  { %466 = vperm.xlu0 %979, %v452_v21  }
  0x1f   :  { %590 = vperm.xlu1 %980, %v580_v24  }
  0x20   :  { %585 = vperm.xlu0 %979, %v579_v23  }
  0x23   :  { %600 = vperm.xlu1 %980, %v582_v26  }
  0x24   :  { %595 = vperm.xlu0 %979, %v581_v25  }
  0x27   :  { %336 = vperm.xlu1 %980, %v322_v28  }
  0x28   :  { %708 = vperm.xlu0 %979, %v705_v27  }
  0x2c   :  { %341 = vperm.xlu0 %979, %v323_v29  }
  0x82   :  { %v71_v32 = vpop.permute.xlu1 %70 }
  0x83   :  { %v61_v31 = vpop.permute.xlu0 %60 }
  0x86   :  { %v76_v39 = vpop.permute.xlu1 %75 }
  0x87   :  { %v66_v33 = vpop.permute.xlu0 %65 }
  0x8a   :  { %v202_v53 = vpop.permute.xlu1 %201 }
  0x8b   :  { %v197_v54 = vpop.permute.xlu0 %196 }
  0x8e   :  { %v212_v60 = vpop.permute.xlu1 %211 }
  0x8f   :  { %v207_v63 = vpop.permute.xlu0 %206 }
  0x92   :  { %v332_v13 = vpop.permute.xlu1 %331 }
  0x93   :  { %v327_v11 = vpop.permute.xlu0 %326 }
  0x96   :  { %v462_v15 = vpop.permute.xlu1 %461 }
  0x97   :  { %v457_v12 = vpop.permute.xlu0 %456 }
  0x9a   :  { %v472_v17 = vpop.permute.xlu1 %471 }
  0x9b   :  { %v467_v14 = vpop.permute.xlu0 %466 }
  0x9e   :  { %v591_v19 = vpop.permute.xlu1 %590 }
  0x9f   :  { %v1183_v16 = vpop.permute.xlu0 %585 }
  0xa2   :  { %v1189_v21 = vpop.permute.xlu1 %600 }
  0xa3   :  { %v1185_v18 = vpop.permute.xlu0 %595 }
  0xa6   :  { %v337_v29 = vpop.permute.xlu1 %336 }
  0xa7   :  { %v1187_v20 = vpop.permute.xlu0 %708 }
  0xab   :  { %v342_v26 = vpop.permute.xlu0 %341 }
  0xdf   :  { %v868_v34 = vpop.f32.mrb[0].mxu0 }
  0xe0   :  { %v169_v35 = vadd.f32 %v868_v34, %v66_v33  ;;  %v163_v36 = vpop.f32.mrb[1].mxu0  ;;  %v447_v33 = vld [vmem:[%s1255_s7 + $0x8] sm:$0xff]  ;;  %v448_v34 = vld [vmem:[%s1255_s7 + $0x10] sm:$0xff] }
  0xe1   :  { %v164_v37 = vadd.f32 %v163_v36, %v61_v31  ;;  %v575_v36 = vld [vmem:[%s1257_s9] sm:$0xff] }
  0xe2   :  { %v183_v38 = vmax.f32 %v169_v35, 0.0  ;;  %v449_v35 = vld [vmem:[%s1255_s7 + $0x18] sm:$0xff] }
  0xe3   :  { %v182_v40 = vmax.f32 %v164_v37, 0.0  ;;  %v871_v41 = vpop.f32.mrb[2].mxu0 }
  0xe4   :  { %v179_v42 = vadd.f32 %v871_v41, %v76_v39  ;;  %v173_v43 = vpop.f32.mrb[3].mxu0 }
  0xe5   :  { %v174_v44 = vadd.f32 %v173_v43, %v71_v32  ;;  %v941_v45 = vpack.c.bf16 %v183_v38, %v182_v40 }
  0xe6   :  { %v185_v46 = vmax.f32 %v179_v42, 0.0 }
  0xe7   :  { %v184_v47 = vmax.f32 %v174_v44, 0.0  ;;  %942 = vmatprep.subr.bf16.mxu1 %v941_v45 }
  0xe8   :  { %944 = vmatpush3.bf16.msra.mxu1 %v941_v45 }
  0xe9   :  { %v945_v48 = vpack.c.bf16 %v185_v46, %v184_v47 }
  0xeb   :  { %946 = vmatprep.subr.bf16.mxu1 %v945_v48 }
  0xec   :  { %948 = vmatpush3.bf16.msra.mxu1 %v945_v48 }
  0xef   :  { %881 = vmatmul.mubr.msk.f32.vlgmr.msra.gmra.mrb[0].mxu1 %vm214_vm2, %v187_v49 }
  0xf0   :  { %883 = vmatprep.mubr.msk.f32.mxu1 %vm214_vm2, %v188_v50 }
  0xf3   :  { %884 = vmatmul.mubr.msk.f32.gmra.mrb[2].mxu1 %vm214_vm2, %v189_v51  ;;  %v576_v51 = vld [vmem:[%s1257_s9 + $0x8] sm:$0xff] }
  0xf4   :  { %904 = vmatprep.mubr.msk.f32.mxu1 %vm78_vm0, %v446_v10 }
 0x1c2   :  { %v882_v55 = vpop.f32.mrb[0].mxu1 }
 0x1c3   :  { %v299_v56 = vadd.f32 %v882_v55, %v202_v53  ;;  %v293_v57 = vpop.f32.mrb[1].mxu1  ;;  %v578_v53 = vld [vmem:[%s1257_s9 + $0x18] sm:$0xff]  ;;  %v984_v55 = vmov 0.0  }
 0x1c4   :  { %v294_v58 = vadd.f32 %v293_v57, %v197_v54  ;;  %v982_v54 = vmov 0.0|0.0  }
 0x1c5   :  { %v313_v59 = vmax.f32 %v299_v56, 0.0 }
 0x1c6   :  { %v312_v61 = vmax.f32 %v294_v58, 0.0  ;;  %v885_v62 = vpop.f32.mrb[2].mxu1 }
 0x1c7   :  { %v309_v0 = vadd.f32 %v885_v62, %v212_v60  ;;  %v303_v1 = vpop.f32.mrb[3].mxu1 }
 0x1c8   :  { %v949_v2 = vpack.c.bf16 %v313_v59, %v312_v61  ;;  %v304_v3 = vadd.f32 %v303_v1, %v207_v63 }
 0x1c9   :  { %v315_v4 = vmax.f32 %v309_v0, 0.0 }
 0x1ca   :  { %v314_v5 = vmax.f32 %v304_v3, 0.0  ;;  %950 = vmatprep.subr.bf16.mxu0 %v949_v2 }
 0x1cb   :  { %952 = vmatpush3.bf16.msra.mxu0 %v949_v2 }
 0x1cc   :  { %v953_v6 = vpack.c.bf16 %v315_v4, %v314_v5 }
 0x1ce   :  { %954 = vmatprep.subr.bf16.mxu0 %v953_v6 }
 0x1cf   :  { %956 = vmatpush3.bf16.msra.mxu0 %v953_v6  ;;  %v704_v6 = vld [vmem:[%s1258_s11] sm:$0x1] }
 0x1d2   :  { %895 = vmatmul.mubr.msk.f32.vlgmr.msra.gmra.mrb[4].mxu0 %vm214_vm2, %v317_v7  ;;  %v711_v7 = vlaneseq }
 0x1d3   :  { %897 = vmatprep.mubr.msk.f32.mxu0 %vm214_vm2, %v318_v8 }
 0x1d4   :  { %v712_v8 = vshrl.u32 %v711_v7, 7 }
 0x1d6   :  { %898 = vmatmul.mubr.msk.f32.gmra.mrb[6].mxu0 %vm214_vm2, %v319_v9  ;;  %v713_v9 = vsub.s32 0, %v712_v8 }
 0x1d7   :  { %918 = vmatprep.mubr.msk.f32.mxu0 %vm214_vm2, %v575_v36 }
 0x1d8   :  { %v714_v10 = vrot.slane %v1187_v20, %v713_v9 }
 0x2a5   :  { %v896_v22 = vpop.f32.mrb[4].mxu0 }
 0x2a6   :  { %v428_v23 = vadd.f32 %v896_v22, %v332_v13  ;;  %v422_v24 = vpop.f32.mrb[5].mxu0 }
 0x2a7   :  { %v423_v25 = vadd.f32 %v422_v24, %v327_v11 }
 0x2a8   :  { %442 = vst.msk [vmem:[%s1256_s13 + $0x8] sm:$0xff] %vm78_vm0, %v428_v23 }
 0x2a9   :  { %441 = vst.msk [vmem:[%s1256_s13] sm:$0xff] %vm78_vm0, %v423_v25  ;;  %v957_v27 = vpack.c.bf16 %v428_v23, %v423_v25  ;;  %v899_v28 = vpop.f32.mrb[6].mxu0 }
 0x2aa   :  { %v438_v30 = vadd.f32 %v899_v28, %v342_v26  ;;  %v432_v31 = vpop.f32.mrb[7].mxu0 }
 0x2ab   :  { %v433_v32 = vadd.f32 %v432_v31, %v337_v29  ;;  %958 = vmatprep.subr.bf16.mxu1 %v957_v27 }
 0x2ac   :  { %445 = vst.msk [vmem:[%s1256_s13 + $0x18] sm:$0x7f] %vm444_vm3, %v438_v30  ;;  %960 = vmatpush3.bf16.msra.mxu1 %v957_v27 }
 0x2ad   :  { %443 = vst.msk [vmem:[%s1256_s13 + $0x10] sm:$0xff] %vm78_vm0, %v433_v32  ;;  %969 = vmatprep.subr.bf16.mxu1 %v982_v54 }
 0x2af   :  { %905 = vmatmul.mubr.msk.f32.vlgmr.msra.gmra.mrb[4].mxu1 %vm78_vm0, %v447_v33 }
 0x2b0   :  { %907 = vmatprep.mubr.msk.f32.mxu1 %vm78_vm0, %v448_v34 }
 0x2b3   :  { %908 = vmatmul.mubr.msk.f32.gmra.mrb[6].mxu1 %vm78_vm0, %v449_v35 }
 0x2b4   :  { %932 = vmatprep.mubr.msk.f32.mxu1 %vm983_vm4, %v984_v55 }
 0x382   :  { %v906_v37 = vpop.f32.mrb[4].mxu1 }
 0x383   :  { %v558_v38 = vadd.f32 %v906_v37, %v462_v15  ;;  %v552_v39 = vpop.f32.mrb[5].mxu1 }
 0x384   :  { %v553_v40 = vadd.f32 %v552_v39, %v457_v12 }
 0x385   :  { %v572_v41 = vmax.f32 %v558_v38, 0.0 }
 0x386   :  { %v571_v42 = vmax.f32 %v553_v40, 0.0  ;;  %v909_v43 = vpop.f32.mrb[6].mxu1 }
 0x387   :  { %v568_v44 = vadd.f32 %v909_v43, %v472_v17  ;;  %v562_v45 = vpop.f32.mrb[7].mxu1 }
 0x388   :  { %v961_v46 = vpack.c.bf16 %v572_v41, %v571_v42  ;;  %v563_v47 = vadd.f32 %v562_v45, %v467_v14 }
 0x389   :  { %v574_v48 = vmax.f32 %v568_v44, 0.0 }
 0x38a   :  { %v573_v49 = vmax.f32 %v563_v47, 0.0  ;;  %962 = vmatprep.subr.bf16.mxu0 %v961_v46 }
 0x38b   :  { %964 = vmatpush3.bf16.msra.mxu0 %v961_v46 }
 0x38c   :  { %v965_v50 = vpack.c.bf16 %v574_v48, %v573_v49 }
 0x38e   :  { %966 = vmatprep.subr.bf16.mxu0 %v965_v50 }
 0x38f   :  { %968 = vmatpush3.bf16.msra.mxu0 %v965_v50 }
 0x392   :  { %919 = vmatmul.mubr.msk.f32.vlgmr.msra.gmra.mrb[8].mxu0 %vm214_vm2, %v576_v51 }
 0x393   :  { %921 = vmatprep.mubr.msk.f32.mxu0 %vm214_vm2, %v577_v52 }
 0x396   :  { %922 = vmatmul.mubr.msk.f32.gmra.mrb[10].mxu0 %vm214_vm2, %v578_v53 }
 0x465   :  { %v920_v56 = vpop.f32.mrb[8].mxu0 }
 0x466   :  { %v687_v57 = vadd.f32 %v920_v56, %v591_v19  ;;  %v681_v58 = vpop.f32.mrb[9].mxu0 }
 0x467   :  { %v682_v59 = vadd.f32 %v681_v58, %v1183_v16 }
 0x468   :  { %v701_v60 = vmax.f32 %v687_v57, 0.0 }
 0x469   :  { %v700_v61 = vmax.f32 %v682_v59, 0.0  ;;  %v923_v62 = vpop.f32.mrb[10].mxu0 }
 0x46a   :  { %v697_v63 = vadd.f32 %v923_v62, %v1189_v21  ;;  %v691_v0 = vpop.f32.mrb[11].mxu0 }
 0x46b   :  { %v970_v1 = vpack.c.bf16 %v701_v60, %v700_v61  ;;  %v692_v2 = vadd.f32 %v691_v0, %v1185_v18 }
 0x46c   :  { %v703_v3 = vmax.f32 %v697_v63, 0.0 }
 0x46d   :  { %v702_v4 = vmax.f32 %v692_v2, 0.0  ;;  %971 = vmatpush3.bf16.msra.mxu1 %v970_v1 }
 0x46e   :  { %972 = vmatprep.subr.bf16.mxu1 %v982_v54 }
 0x46f   :  { %v973_v5 = vpack.c.bf16 %v703_v3, %v702_v4 }
 0x471   :  { %974 = vmatpush3.bf16.msra.mxu1 %v973_v5 }
 0x474   :  { %933 = vmatmul.mubr.msk.f32.vlgmr.msra.gmra.mrb[8].mxu1 %vm214_vm2, %v704_v6 }
 0x547   :  { %v784_v11 = vpop.f32.mrb[8].mxu1 }
 0x548   :  { %v785_v12 = vadd.f32 %v784_v11, %v714_v10  ;;  %v934_v13 = vpop.f32.mrb[9].mxu1 }
 0x54a   :  { %789 = vst.msk [vmem:[%s1259_s14] sm:$0x1] %vm788_vm5, %v785_v12 }

</bundles_post_ra>
